<compile_context>
chip_gen: v5e
topology: v5e:2x2
jax: 0.10.0
libtpu: 0.0.40
codegen_flags: <defaults>
</compile_context>

<pallas_src>
import jax
import jax.numpy as jnp
from jax.experimental import pallas as pl
from jax.experimental.pallas import tpu as pltpu


_HIDDEN = 128  # lane-dense width used for every hidden activation


def _mlp_kernel(x_ref,
                w1_ref, b1_ref,
                w2_ref, b2_ref,
                w3_ref, b3_ref,
                w4_ref, b4_ref,
                o_ref):
    def dense(h, w_ref, b_ref, relu):
        w = w_ref[...]
        if h.dtype != w.dtype:            # only on the bf16-operand path
            h = h.astype(w.dtype)
        # MXU matmul with f32 accumulation; bias add / ReLU stay in f32 (VPU).
        y = jnp.dot(h, w, preferred_element_type=jnp.float32) + b_ref[...]
        if relu:
            y = jnp.maximum(y, 0.0)
        return y

    h = x_ref[...]
    h = dense(h, w1_ref, b1_ref, relu=True)
    h = dense(h, w2_ref, b2_ref, relu=True)
    h = dense(h, w3_ref, b3_ref, relu=True)
    h = dense(h, w4_ref, b4_ref, relu=False)     # last layer: no activation
    o_ref[...] = h.astype(o_ref.dtype)


def _vmem_capacity_bytes():
    """Physical VMEM of the attached TPU; conservative (v7x-sized) fallback."""
    try:
        info = pltpu.get_tpu_info()
        cap = getattr(info, "vmem_capacity_bytes", None)
        if cap:
            return int(cap)
    except Exception:
        pass
    return 64 * 1024 * 1024


def _pick_tile_b(B, D, num_classes, elem_bytes, weight_bytes, vmem_budget):
    """Largest batch tile (multiple of 8) that fits the VMEM budget, prefers a
    tile that divides B, and keeps >= 2 grid steps so both v7x cores work."""
    if B <= 8:
        return B  # single full-batch tile (block == full dim is legal)
    # Per-row VMEM: x + out (double-buffered) plus ~4 f32 (row, 128) temporaries.
    per_row = 2 * (elem_bytes * D + 4 * num_classes) + 4 * 4 * _HIDDEN
    avail = vmem_budget - 2 * weight_bytes - (4 << 20)     # 4 MiB slack
    max_rows = max(8, avail // per_row)
    cap = min(2048, max_rows)
    if B >= 16:
        cap = min(cap, max(8, (B // 2) // 8 * 8))           # >= 2 grid steps
    cap = max(8, (int(cap) // 8) * 8)
    for t in range(cap, 7, -8):            # prefer a divisor of B (no padding)
        if B % t == 0:
            return t
    return cap                             # ragged batch: caller pads rows


def mlp_forward(x, params, *, tile_b=None, use_bf16_matmul=False):
    """4-layer MLP forward pass in a single Pallas kernel.

    x: [B, input_dim]
    params: dict with w1..w4 ([in, out]) and b1..b4 ([1, out])
    """
    B, D = x.shape
    num_classes = params["w4"].shape[1]

    # ---- Prepare weights: pad hidden widths to lane-dense 128 (exact: the
    # padded activation lanes are identically zero through ReLU). ----
    def pad2(a, rows, cols):
        return jnp.pad(a, ((0, rows - a.shape[0]), (0, cols - a.shape[1])))

    w1, b1 = params["w1"], params["b1"]
    w2, b2 = pad2(params["w2"], _HIDDEN, _HIDDEN), pad2(params["b2"], 1, _HIDDEN)
    w3, b3 = pad2(params["w3"], _HIDDEN, _HIDDEN), pad2(params["b3"], 1, _HIDDEN)
    w4, b4 = pad2(params["w4"], _HIDDEN, num_classes), params["b4"]

    if use_bf16_matmul:
        # bf16 operands + f32 accumulation: faster MXU path on v5e/v6e/v7x.
        # Pre-cast outside the kernel -> no per-grid-step VPU cast.
        w1, w2, w3, w4 = (w.astype(jnp.bfloat16) for w in (w1, w2, w3, w4))
        x = x.astype(jnp.bfloat16)

    elem_bytes = jnp.dtype(x.dtype).itemsize
    weight_bytes = sum(int(a.size) * jnp.dtype(a.dtype).itemsize
                       for a in (w1, b1, w2, b2, w3, b3, w4, b4))

    vmem_cap = _vmem_capacity_bytes()
    vmem_budget = min(int(vmem_cap * 0.6), 96 << 20)

    if tile_b is None:
        tile_b = _pick_tile_b(B, D, num_classes, elem_bytes,
                              weight_bytes, vmem_budget)
    assert tile_b == B or tile_b % 8 == 0, \
        "sub-batch tiles must be a multiple of 8 (TPU sublane constraint)"

    # Ragged batches: pad rows so the grid tiles evenly; slice rows afterwards.
    B_pad = ((B + tile_b - 1) // tile_b) * tile_b
    x_in = jnp.pad(x, ((0, B_pad - B), (0, 0))) if B_pad != B else x

    # Weights/biases are tiny: keep them fully resident every grid step; only
    # the batch dimension of x / out is tiled.
    full = lambda arr: pl.BlockSpec(arr.shape, lambda i: (0, 0))

    flops = 2 * B_pad * (D * _HIDDEN + 2 * _HIDDEN * _HIDDEN + _HIDDEN * num_classes)
    bytes_accessed = B_pad * (D * elem_bytes + num_classes * 4) + weight_bytes

    out = pl.pallas_call(
        _mlp_kernel,
        out_shape=jax.ShapeDtypeStruct((B_pad, num_classes), jnp.float32),
        grid_spec=pltpu.PrefetchScalarGridSpec(
            num_scalar_prefetch=0,
            grid=(B_pad // tile_b,),
            in_specs=[
                pl.BlockSpec((tile_b, D), lambda i: (i, 0)),   # x tile
                full(w1), full(b1),
                full(w2), full(b2),
                full(w3), full(b3),
                full(w4), full(b4),
            ],
            # Output block's last dim equals the full array dim -> legal even
            # when num_classes < 128; avoids any pad+slice second pass.
            out_specs=pl.BlockSpec((tile_b, num_classes), lambda i: (i, 0)),
        ),
        compiler_params=pltpu.CompilerParams(
            dimension_semantics=("parallel",),       # megacore-shardable (v7x)
            vmem_limit_bytes=int(vmem_budget),
        ),
        cost_estimate=pl.CostEstimate(
            flops=int(flops),
            transcendentals=0,
            bytes_accessed=int(bytes_accessed),
        ),
    )(x_in, w1, b1, w2, b2, w3, b3, w4, b4)

    return out if B_pad == B else out[:B]


def init_params(key, input_dim, num_classes):
    """Deterministic synthetic parameters matching nn.Linear shapes
    (stored transposed: [in, out])."""
    dims = [input_dim, 128, 64, 32, num_classes]
    params = {}
    for idx in range(4):
        fan_in, fan_out = dims[idx], dims[idx + 1]
        key, kw, kb = jax.random.split(key, 3)
        bound = 1.0 / (fan_in ** 0.5)  # PyTorch Linear default init range
        params[f"w{idx+1}"] = jax.random.uniform(
            kw, (fan_in, fan_out), jnp.float32, -bound, bound)
        params[f"b{idx+1}"] = jax.random.uniform(
            kb, (1, fan_out), jnp.float32, -bound, bound)
    return params


def mlp_reference(x, params):
    h = x
    for idx in range(1, 4):
        h = jnp.maximum(h @ params[f"w{idx}"] + params[f"b{idx}"], 0.0)
    return h @ params["w4"] + params["b4"]


if __name__ == "__main__":
    key = jax.random.PRNGKey(0)
    batch, input_dim, num_classes = 8, 32, 10

    kx, kp = jax.random.split(key)
    x = jax.random.normal(kx, (batch, input_dim), jnp.float32)
    params = init_params(kp, input_dim, num_classes)

    # Small-shape check (single tile), exact f32 path.
    out = jax.block_until_ready(mlp_forward(x, params))
    ref = mlp_reference(x, params)
    assert out.shape == (batch, num_classes)
    assert jnp.allclose(out, ref, atol=1e-4, rtol=1e-4)

    # Multi-tile check: exercises the pipelined grid path (grid > 1).
    kx2, kx3 = jax.random.split(kx)
    x2 = jax.random.normal(kx2, (64, input_dim), jnp.float32)
    out2 = jax.block_until_ready(mlp_forward(x2, params, tile_b=16))
    ref2 = mlp_reference(x2, params)
    assert jnp.allclose(out2, ref2, atol=1e-4, rtol=1e-4)

    # Ragged batch check: B=20 is padded to a multiple of the chosen tile.
    x3 = jax.random.normal(kx3, (20, input_dim), jnp.float32)
    out3 = jax.block_until_ready(mlp_forward(x3, params))
    ref3 = mlp_reference(x3, params)
    assert out3.shape == (20, num_classes)
    assert jnp.allclose(out3, ref3, atol=1e-4, rtol=1e-4)

    # bf16-operand path (f32 accumulation): loose-tolerance smoke check.
    out_bf16 = jax.block_until_ready(mlp_forward(x2, params, use_bf16_matmul=True))
    assert out_bf16.shape == (64, num_classes)
    assert bool(jnp.all(jnp.isfinite(out_bf16)))
    assert float(jnp.max(jnp.abs(out_bf16 - ref2))) < 0.25

    print("KERNEL_OK")
</pallas_src>

<mosaic_0001>
module attributes {stable_mosaic.version = 11 : i64} {
  func.func @_mlp_kernel(%arg0: i32, %arg1: memref<8x32xf32, #tpu.memory_space<vmem>>, %arg2: memref<32x128xf32, #tpu.memory_space<vmem>>, %arg3: memref<1x128xf32, #tpu.memory_space<vmem>>, %arg4: memref<128x128xf32, #tpu.memory_space<vmem>>, %arg5: memref<1x128xf32, #tpu.memory_space<vmem>>, %arg6: memref<128x128xf32, #tpu.memory_space<vmem>>, %arg7: memref<1x128xf32, #tpu.memory_space<vmem>>, %arg8: memref<128x10xf32, #tpu.memory_space<vmem>>, %arg9: memref<1x10xf32, #tpu.memory_space<vmem>>, %arg10: memref<8x10xf32, #tpu.memory_space<vmem>>) attributes {dimension_semantics = [#tpu.dimension_semantics<parallel>], iteration_bounds = array<i64: 1>, scalar_prefetch = 0 : i64, scratch_operands = 0 : i64, tpu.core_type = #tpu.core_type<tc>, window_params = [{transform_indices = @transform_0, window_bounds = array<i64: 8, 32>}, {pipeline_mode = #tpu.pipeline_mode<synchronous>, transform_indices = @transform_1, window_bounds = array<i64: 32, 128>}, {pipeline_mode = #tpu.pipeline_mode<synchronous>, transform_indices = @transform_2, window_bounds = array<i64: 1, 128>}, {pipeline_mode = #tpu.pipeline_mode<synchronous>, transform_indices = @transform_3, window_bounds = array<i64: 128, 128>}, {pipeline_mode = #tpu.pipeline_mode<synchronous>, transform_indices = @transform_4, window_bounds = array<i64: 1, 128>}, {pipeline_mode = #tpu.pipeline_mode<synchronous>, transform_indices = @transform_5, window_bounds = array<i64: 128, 128>}, {pipeline_mode = #tpu.pipeline_mode<synchronous>, transform_indices = @transform_6, window_bounds = array<i64: 1, 128>}, {pipeline_mode = #tpu.pipeline_mode<synchronous>, transform_indices = @transform_7, window_bounds = array<i64: 128, 10>}, {pipeline_mode = #tpu.pipeline_mode<synchronous>, transform_indices = @transform_8, window_bounds = array<i64: 1, 10>}, {transform_indices = @transform_9, window_bounds = array<i64: 8, 10>}]} {
    %c0 = arith.constant 0 : index
    %c0_0 = arith.constant 0 : index
    %0 = vector.load %arg1[%c0, %c0_0] : memref<8x32xf32, #tpu.memory_space<vmem>>, vector<8x32xf32>
    %c0_1 = arith.constant 0 : index
    %c0_2 = arith.constant 0 : index
    %1 = vector.load %arg2[%c0_1, %c0_2] : memref<32x128xf32, #tpu.memory_space<vmem>>, vector<32x128xf32>
    %cst = arith.constant dense<0.000000e+00> : vector<8x128xf32>
    %2 = tpu.matmul %0, %1, %cst {dimension_numbers = #tpu.dot_dimension_numbers<[1], [0], [0], [1], [0, 0, 1, 1], [], []>} : vector<8x32xf32>, vector<32x128xf32>, vector<8x128xf32> -> vector<8x128xf32>
    %c0_3 = arith.constant 0 : index
    %c0_4 = arith.constant 0 : index
    %3 = vector.load %arg3[%c0_3, %c0_4] : memref<1x128xf32, #tpu.memory_space<vmem>>, vector<1x128xf32>
    %4 = vector.broadcast %3 : vector<1x128xf32> to vector<8x128xf32>
    %5 = arith.addf %2, %4 : vector<8x128xf32>
    %cst_5 = arith.constant 0.000000e+00 : f32
    %6 = vector.broadcast %cst_5 : f32 to vector<8x128xf32>
    %7 = arith.maximumf %5, %6 : vector<8x128xf32>
    %c0_6 = arith.constant 0 : index
    %c0_7 = arith.constant 0 : index
    %8 = vector.load %arg4[%c0_6, %c0_7] : memref<128x128xf32, #tpu.memory_space<vmem>>, vector<128x128xf32>
    %cst_8 = arith.constant dense<0.000000e+00> : vector<8x128xf32>
    %9 = tpu.matmul %7, %8, %cst_8 {dimension_numbers = #tpu.dot_dimension_numbers<[1], [0], [0], [1], [0, 0, 1, 1], [], []>} : vector<8x128xf32>, vector<128x128xf32>, vector<8x128xf32> -> vector<8x128xf32>
    %c0_9 = arith.constant 0 : index
    %c0_10 = arith.constant 0 : index
    %10 = vector.load %arg5[%c0_9, %c0_10] : memref<1x128xf32, #tpu.memory_space<vmem>>, vector<1x128xf32>
    %11 = vector.broadcast %10 : vector<1x128xf32> to vector<8x128xf32>
    %12 = arith.addf %9, %11 : vector<8x128xf32>
    %cst_11 = arith.constant 0.000000e+00 : f32
    %13 = vector.broadcast %cst_11 : f32 to vector<8x128xf32>
    %14 = arith.maximumf %12, %13 : vector<8x128xf32>
    %c0_12 = arith.constant 0 : index
    %c0_13 = arith.constant 0 : index
    %15 = vector.load %arg6[%c0_12, %c0_13] : memref<128x128xf32, #tpu.memory_space<vmem>>, vector<128x128xf32>
    %cst_14 = arith.constant dense<0.000000e+00> : vector<8x128xf32>
    %16 = tpu.matmul %14, %15, %cst_14 {dimension_numbers = #tpu.dot_dimension_numbers<[1], [0], [0], [1], [0, 0, 1, 1], [], []>} : vector<8x128xf32>, vector<128x128xf32>, vector<8x128xf32> -> vector<8x128xf32>
    %c0_15 = arith.constant 0 : index
    %c0_16 = arith.constant 0 : index
    %17 = vector.load %arg7[%c0_15, %c0_16] : memref<1x128xf32, #tpu.memory_space<vmem>>, vector<1x128xf32>
    %18 = vector.broadcast %17 : vector<1x128xf32> to vector<8x128xf32>
    %19 = arith.addf %16, %18 : vector<8x128xf32>
    %cst_17 = arith.constant 0.000000e+00 : f32
    %20 = vector.broadcast %cst_17 : f32 to vector<8x128xf32>
    %21 = arith.maximumf %19, %20 : vector<8x128xf32>
    %c0_18 = arith.constant 0 : index
    %c0_19 = arith.constant 0 : index
    %22 = vector.load %arg8[%c0_18, %c0_19] : memref<128x10xf32, #tpu.memory_space<vmem>>, vector<128x10xf32>
    %cst_20 = arith.constant dense<0.000000e+00> : vector<8x10xf32>
    %23 = tpu.matmul %21, %22, %cst_20 {dimension_numbers = #tpu.dot_dimension_numbers<[1], [0], [0], [1], [0, 0, 1, 1], [], []>} : vector<8x128xf32>, vector<128x10xf32>, vector<8x10xf32> -> vector<8x10xf32>
    %c0_21 = arith.constant 0 : index
    %c0_22 = arith.constant 0 : index
    %24 = vector.load %arg9[%c0_21, %c0_22] : memref<1x10xf32, #tpu.memory_space<vmem>>, vector<1x10xf32>
    %25 = vector.broadcast %24 : vector<1x10xf32> to vector<8x10xf32>
    %26 = arith.addf %23, %25 : vector<8x10xf32>
    %c0_23 = arith.constant 0 : index
    %c0_24 = arith.constant 0 : index
    %27 = vector.load %arg10[%c0_23, %c0_24] : memref<8x10xf32, #tpu.memory_space<vmem>>, vector<8x10xf32>
    tpu.vector_store %arg10[%c0_23, %c0_24], %26 {strides = array<i32>} : memref<8x10xf32, #tpu.memory_space<vmem>>, vector<8x10xf32>,
    return
  }
  func.func @transform_0(%arg0: i32) -> (i32, i32) {
    %c0_i32 = arith.constant 0 : i32
    %c0_i32_0 = arith.constant 0 : i32
    return %arg0, %c0_i32 : i32, i32
  }
  func.func @transform_1(%arg0: i32) -> (i32, i32) {
    %c0_i32 = arith.constant 0 : i32
    %c0_i32_0 = arith.constant 0 : i32
    %c0_i32_1 = arith.constant 0 : i32
    return %c0_i32, %c0_i32_0 : i32, i32
  }
  func.func @transform_2(%arg0: i32) -> (i32, i32) {
    %c0_i32 = arith.constant 0 : i32
    %c0_i32_0 = arith.constant 0 : i32
    %c0_i32_1 = arith.constant 0 : i32
    return %c0_i32, %c0_i32_0 : i32, i32
  }
  func.func @transform_3(%arg0: i32) -> (i32, i32) {
    %c0_i32 = arith.constant 0 : i32
    %c0_i32_0 = arith.constant 0 : i32
    %c0_i32_1 = arith.constant 0 : i32
    return %c0_i32, %c0_i32_0 : i32, i32
  }
  func.func @transform_4(%arg0: i32) -> (i32, i32) {
    %c0_i32 = arith.constant 0 : i32
    %c0_i32_0 = arith.constant 0 : i32
    %c0_i32_1 = arith.constant 0 : i32
    return %c0_i32, %c0_i32_0 : i32, i32
  }
  func.func @transform_5(%arg0: i32) -> (i32, i32) {
    %c0_i32 = arith.constant 0 : i32
    %c0_i32_0 = arith.constant 0 : i32
    %c0_i32_1 = arith.constant 0 : i32
    return %c0_i32, %c0_i32_0 : i32, i32
  }
  func.func @transform_6(%arg0: i32) -> (i32, i32) {
    %c0_i32 = arith.constant 0 : i32
    %c0_i32_0 = arith.constant 0 : i32
    %c0_i32_1 = arith.constant 0 : i32
    return %c0_i32, %c0_i32_0 : i32, i32
  }
  func.func @transform_7(%arg0: i32) -> (i32, i32) {
    %c0_i32 = arith.constant 0 : i32
    %c0_i32_0 = arith.constant 0 : i32
    %c0_i32_1 = arith.constant 0 : i32
    return %c0_i32, %c0_i32_0 : i32, i32
  }
  func.func @transform_8(%arg0: i32) -> (i32, i32) {
    %c0_i32 = arith.constant 0 : i32
    %c0_i32_0 = arith.constant 0 : i32
    %c0_i32_1 = arith.constant 0 : i32
    return %c0_i32, %c0_i32_0 : i32, i32
  }
  func.func @transform_9(%arg0: i32) -> (i32, i32) {
    %c0_i32 = arith.constant 0 : i32
    %c0_i32_0 = arith.constant 0 : i32
    return %arg0, %c0_i32 : i32, i32
  }
}

</mosaic_0001>

<bundles_post_ra>
// kernel: tpu_custom_call.1
= control target key start
LH: loop header
LB: loop body
LE: loop exit
PB: predicated region body
PF: predicated region fallthrough
CT: control target
= control target key end

     0   :  { %14 = vsyncpa [#allocation3], 0  ;;  %s504_s0 = inlined_call_operand.vmem [shape: f32[8,32], index: 0, kind: input, shape index: {}]   ;;  %s505_s1 = inlined_call_operand.hbm [shape: f32[32,128], index: 1, kind: input, shape index: {}]   ;;  %s506_s2 = inlined_call_operand.vmem [shape: f32[1,128], index: 2, kind: input, shape index: {}]   ;;  %s507_s3 = inlined_call_operand.vmem [shape: f32[128,128], index: 3, kind: input, shape index: {}]   ;;  %s508_s4 = inlined_call_operand.vmem [shape: f32[1,128], index: 4, kind: input, shape index: {}]   ;;  %s509_s5 = inlined_call_operand.hbm [shape: f32[128,128], index: 5, kind: input, shape index: {}]   ;;  %s510_s6 = inlined_call_operand.vmem [shape: f32[1,128], index: 6, kind: input, shape index: {}]   ;;  %s511_s7 = inlined_call_operand.vmem [shape: f32[128,10], index: 7, kind: input, shape index: {}]   ;;  %s512_s8 = inlined_call_operand.vmem [shape: f32[1,10], index: 8, kind: input, shape index: {}]   ;;  %s513_s9 = inlined_call_operand.hbm [shape: f32[8,10], index: 9, kind: output, shape index: {}]  }
   0x1   :  { %15 = vsyncpa [#allocation6], 0 }
   0x2   :  { %16 = vsyncpa [#allocation4], 0  ;;  %s23_s11 = sshll.u32 %s505_s1, 4  ;;  %s329_s12 = smov [#allocation2]   ;;  %s24_s11 = int_to_ptr.hbm [resolvable:$true] %s23_s11 }
   0x3   :  { %s25_s13 = sshll.u32 %s329_s12, 4  ;;  %s42_s16 = sshll.u32 %s509_s5, 4  ;;  %s26_s13 = int_to_ptr.vmem [resolvable:$true] %s25_s13  ;;  %s43_s16 = int_to_ptr.hbm [resolvable:$true] %s42_s16 }
   0x4   :  { %s330_s17 = smov 128   ;;  %s331_s18 = smov 8  }
   0x5   :  { %31 = dma.hbm_to_vmem [thread:$0]  %s24_s11, 512, %s26_s13, [#allocation3], %s330_s17, %s330_s17, %s331_s18  }
   0x6   :  { %s332_s19 = smov [#allocation5]  }
   0x7   :  { %s44_s20 = sshll.u32 %s332_s19, 4  ;;  %s45_s20 = int_to_ptr.vmem [resolvable:$true] %s44_s20 }
   0x8   :  { %50 = dma.hbm_to_vmem [thread:$0]  %s43_s16, 2048, %s45_s20, [#allocation6], %s330_s17, %s330_s17, %s331_s18  }
   0x9   :  { %323 = dma.done.wait [#allocation3], 512  }
   0xa   :  { %324 = vsyncadd [#allocation3], 4294966784 }
   0xb   :  { %325 = dma.done.wait [#allocation6], 2048  }
   0xc   :  { %326 = vsyncadd [#allocation6], 4294965248  ;;  %v69_v0 = vld [vmem:[#allocation2 + $0x18] sm:$0xff]  ;;  %v68_v1 = vld [vmem:[#allocation2 + $0x10] sm:$0xff]  ;;  %vm74_vm0 = vcmask 261120   ;;  %s333_s18 = smov [#allocation7]  }
   0xd   :  { %90 = vmatpush.msra.mxu0 %v69_v0  ;;  %v114_v2 = vld [vmem:[%s507_s3 + $0x78] sm:$0xff]  ;;  %v67_v3 = vld [vmem:[#allocation2 + $0x8] sm:$0xff]  ;;  %v113_v4 = vld [vmem:[%s507_s3 + $0x70] sm:$0xff]  ;;  %s228_s19 = sshll.u32 %s333_s18, 4  ;;  %s230_s21 = sshll.u32 %s513_s9, 4  ;;  %vm221_vm1 = vcmask 80896   ;;  %s229_s19 = int_to_ptr.vmem [resolvable:$true] %s228_s19  ;;  %s231_s21 = int_to_ptr.hbm [resolvable:$true] %s230_s21 }
   0xe   :  { %119 = vmatpush.msra.mxu1 %v114_v2  ;;  %v112_v5 = vld [vmem:[%s507_s3 + $0x68] sm:$0xff]  ;;  %v66_v6 = vld [vmem:[#allocation2] sm:$0xff]  ;;  %v110_v9 = vld [vmem:[%s507_s3 + $0x58] sm:$0xff] }
   0xf   :  { %91 = vmatpush.msra.mxu0 %v68_v1  ;;  %v65_v7 = vld [vmem:[%s504_s0] sm:$0xff]  ;;  %v109_v10 = vld [vmem:[%s507_s3 + $0x50] sm:$0xff]  ;;  %v108_v11 = vld [vmem:[%s507_s3 + $0x48] sm:$0xff] }
  0x10   :  { %120 = vmatpush.msra.mxu1 %v113_v4  ;;  %v111_v8 = vld [vmem:[%s507_s3 + $0x60] sm:$0xff]  ;;  %v106_v13 = vld [vmem:[%s507_s3 + $0x38] sm:$0xff]  ;;  %v105_v14 = vld [vmem:[%s507_s3 + $0x30] sm:$0xff] }
  0x11   :  { %92 = vmatpush.msra.mxu0 %v67_v3  ;;  %v107_v12 = vld [vmem:[%s507_s3 + $0x40] sm:$0xff]  ;;  %v104_v15 = vld [vmem:[%s507_s3 + $0x28] sm:$0xff]  ;;  %v102_v17 = vld [vmem:[%s507_s3 + $0x18] sm:$0xff] }
  0x12   :  { %121 = vmatpush.msra.mxu1 %v112_v5  ;;  %v103_v16 = vld [vmem:[%s507_s3 + $0x20] sm:$0xff]  ;;  %v101_v18 = vld [vmem:[%s507_s3 + $0x10] sm:$0xff]  ;;  %v100_v19 = vld [vmem:[%s507_s3 + $0x8] sm:$0xff] }
  0x13   :  { %93 = vmatpush.msra.mxu0 %v66_v6  ;;  %v99_v20 = vld [vmem:[%s507_s3] sm:$0xff]  ;;  %v155_v21 = vld [vmem:[#allocation5 + $0x78] sm:$0xff]  ;;  %v154_v22 = vld [vmem:[#allocation5 + $0x70] sm:$0xff] }
  0x14   :  { %241 = vmatmul.msk.f32.vlgmr.msra.gmra.mxu0 %vm74_vm0, %v65_v7  ;;  %122 = vmatpush.msra.mxu1 %v111_v8  ;;  %v153_v23 = vld [vmem:[#allocation5 + $0x68] sm:$0xff]  ;;  %v152_v24 = vld [vmem:[#allocation5 + $0x60] sm:$0xff]  ;;  %v151_v25 = vld [vmem:[#allocation5 + $0x58] sm:$0xff] }
  0x15   :  { %160 = vmatpush.msra.mxu2 %v155_v21  ;;  %v150_v26 = vld [vmem:[#allocation5 + $0x50] sm:$0xff]  ;;  %v149_v27 = vld [vmem:[#allocation5 + $0x48] sm:$0xff]  ;;  %v148_v28 = vld [vmem:[#allocation5 + $0x40] sm:$0xff] }
  0x16   :  { %123 = vmatpush.msra.mxu1 %v110_v9  ;;  %v147_v29 = vld [vmem:[#allocation5 + $0x38] sm:$0xff]  ;;  %v146_v30 = vld [vmem:[#allocation5 + $0x30] sm:$0xff]  ;;  %v145_v31 = vld [vmem:[#allocation5 + $0x28] sm:$0xff] }
  0x17   :  { %161 = vmatpush.msra.mxu2 %v154_v22  ;;  %v144_v32 = vld [vmem:[#allocation5 + $0x20] sm:$0xff]  ;;  %v143_v33 = vld [vmem:[#allocation5 + $0x18] sm:$0xff]  ;;  %v142_v38 = vld [vmem:[#allocation5 + $0x10] sm:$0xff] }
  0x18   :  { %124 = vmatpush.msra.mxu1 %v109_v10  ;;  %v247_v34 = vld [vmem:[%s506_s2] ss:$0 sm:$0xff]  ;;  %v141_v39 = vld [vmem:[#allocation5 + $0x8] sm:$0xff]  ;;  %v196_v41 = vld [vmem:[%s511_s7 + $0x78] sm:$0xff] }
  0x19   :  { %162 = vmatpush.msra.mxu2 %v153_v23  ;;  %v140_v40 = vld [vmem:[#allocation5] sm:$0xff]  ;;  %v195_v42 = vld [vmem:[%s511_s7 + $0x70] sm:$0xff]  ;;  %201 = vmatpush.msra.mxu3 %v196_v41  ;;  %v194_v43 = vld [vmem:[%s511_s7 + $0x68] sm:$0xff] }
  0x1a   :  { %125 = vmatpush.msra.mxu1 %v108_v11  ;;  %v193_v44 = vld [vmem:[%s511_s7 + $0x60] sm:$0xff]  ;;  %v192_v45 = vld [vmem:[%s511_s7 + $0x58] sm:$0xff]  ;;  %v191_v46 = vld [vmem:[%s511_s7 + $0x50] sm:$0xff] }
  0x1b   :  { %163 = vmatpush.msra.mxu2 %v152_v24  ;;  %202 = vmatpush.msra.mxu3 %v195_v42  ;;  %v190_v47 = vld [vmem:[%s511_s7 + $0x48] sm:$0xff]  ;;  %v189_v48 = vld [vmem:[%s511_s7 + $0x40] sm:$0xff]  ;;  %v188_v49 = vld [vmem:[%s511_s7 + $0x38] sm:$0xff] }
  0x1c   :  { %126 = vmatpush.msra.mxu1 %v107_v12  ;;  %v187_v50 = vld [vmem:[%s511_s7 + $0x30] sm:$0xff]  ;;  %v186_v51 = vld [vmem:[%s511_s7 + $0x28] sm:$0xff]  ;;  %v185_v52 = vld [vmem:[%s511_s7 + $0x20] sm:$0xff] }
  0x1d   :  { %164 = vmatpush.msra.mxu2 %v151_v25  ;;  %203 = vmatpush.msra.mxu3 %v194_v43  ;;  %v184_v53 = vld [vmem:[%s511_s7 + $0x18] sm:$0xff]  ;;  %v248_v54 = vld [vmem:[%s508_s4] ss:$0 sm:$0xff]  ;;  %v183_v58 = vld [vmem:[%s511_s7 + $0x10] sm:$0xff] }
  0x1e   :  { %127 = vmatpush.msra.mxu1 %v106_v13  ;;  %v182_v59 = vld [vmem:[%s511_s7 + $0x8] sm:$0xff]  ;;  %v181_v60 = vld [vmem:[%s511_s7] sm:$0xff] }
  0x1f   :  { %165 = vmatpush.msra.mxu2 %v150_v26  ;;  %204 = vmatpush.msra.mxu3 %v193_v44  ;;  %v249_v61 = vld [vmem:[%s510_s6] ss:$0 sm:$0xff] }
  0x20   :  { %128 = vmatpush.msra.mxu1 %v105_v14  ;;  %v250_v1 = vld [vmem:[%s512_s8] ss:$0 sm:$0xff] }
  0x21   :  { %166 = vmatpush.msra.mxu2 %v149_v27  ;;  %205 = vmatpush.msra.mxu3 %v192_v45 }
  0x22   :  { %129 = vmatpush.msra.mxu1 %v104_v15 }
  0x23   :  { %167 = vmatpush.msra.mxu2 %v148_v28  ;;  %206 = vmatpush.msra.mxu3 %v191_v46 }
  0x24   :  { %130 = vmatpush.msra.mxu1 %v103_v16 }
  0x25   :  { %168 = vmatpush.msra.mxu2 %v147_v29  ;;  %207 = vmatpush.msra.mxu3 %v190_v47 }
  0x26   :  { %131 = vmatpush.msra.mxu1 %v102_v17 }
  0x27   :  { %169 = vmatpush.msra.mxu2 %v146_v30  ;;  %208 = vmatpush.msra.mxu3 %v189_v48 }
  0x28   :  { %132 = vmatpush.msra.mxu1 %v101_v18 }
  0x29   :  { %170 = vmatpush.msra.mxu2 %v145_v31  ;;  %209 = vmatpush.msra.mxu3 %v188_v49 }
  0x2a   :  { %133 = vmatpush.msra.mxu1 %v100_v19 }
  0x2b   :  { %171 = vmatpush.msra.mxu2 %v144_v32  ;;  %210 = vmatpush.msra.mxu3 %v187_v50 }
  0x2c   :  { %134 = vmatpush.msra.mxu1 %v99_v20 }
  0x2d   :  { %172 = vmatpush.msra.mxu2 %v143_v33  ;;  %211 = vmatpush.msra.mxu3 %v186_v51 }
  0x2f   :  { %173 = vmatpush.msra.mxu2 %v142_v38  ;;  %212 = vmatpush.msra.mxu3 %v185_v52 }
  0x31   :  { %174 = vmatpush.msra.mxu2 %v141_v39  ;;  %213 = vmatpush.msra.mxu3 %v184_v53 }
  0x33   :  { %175 = vmatpush.msra.mxu2 %v140_v40  ;;  %214 = vmatpush.msra.mxu3 %v183_v58 }
  0x35   :  { %215 = vmatpush.msra.mxu3 %v182_v59 }
  0x37   :  { %216 = vmatpush.msra.mxu3 %v181_v60 }
  0x91   :  { %v95_v35 = vpop.f32.mrf.mxu0 }
  0x92   :  { %v96_v36 = vadd.f32 %v247_v34, %v95_v35 }
  0x94   :  { %v98_v37 = vmax.f32 %v96_v36, 0.0 }
  0x96   :  { %135 = vmatmul.f32.vlgmr.msra.gmra.mxu1 %v98_v37 }
 0x113   :  { %v136_v55 = vpop.f32.mrf.mxu1 }
 0x114   :  { %v137_v56 = vadd.f32 %v248_v54, %v136_v55 }
 0x116   :  { %v139_v57 = vmax.f32 %v137_v56, 0.0 }
 0x118   :  { %176 = vmatmul.f32.vlgmr.msra.gmra.mxu2 %v139_v57 }
 0x19b   :  { %v177_v62 = vpop.f32.mrf.mxu2 }
 0x19c   :  { %v178_v63 = vadd.f32 %v249_v61, %v177_v62 }
 0x19e   :  { %v180_v0 = vmax.f32 %v178_v63, 0.0 }
 0x1a0   :  { %217 = vmatmul.f32.vlgmr.msra.gmra.mxu3 %v180_v0 }
 0x223   :  { %v218_v2 = vpop.f32.mrf.mxu3 }
 0x224   :  { %v219_v3 = vadd.f32 %v250_v1, %v218_v2 }
 0x226   :  { %222 = vst.msk [vmem:[#allocation7] sm:$0xff] %vm221_vm1, %v219_v3 }
 0x227   :  { %233 = dma.vmem_to_hbm [thread:$0]  %s229_s19, 128, %s231_s21, [#allocation4]  }
 0x228   :  { %327 = dma.done.wait [#allocation4], 128  }
 0x229   :  { %328 = vsyncadd [#allocation4], 4294967168 }
 0x22a   :  { %238 = vsyncpa [#allocation3], 1 }
 0x22b   :  { %239 = vsyncpa [#allocation6], 1 }
 0x22c   :  { %240 = vsyncpa [#allocation4], 1 }

</bundles_post_ra>
